<compile_context>
chip_gen: v5e
topology: v5e:2x2
jax: 0.10.0
libtpu: 0.0.40
codegen_flags: <defaults>
</compile_context>

<pallas_src>
import functools

import jax
import jax.numpy as jnp
import numpy as np
from jax.experimental import pallas as pl
from jax.experimental.pallas import tpu as pltpu


def _round_up(v, m):
    return (v + m - 1) // m * m


def _upconv_parity_kernel(x_ref, w_ref, b_ref, o_ref, *, cp, wp2, lout):
    """One (image, row-tile) per grid step.

    x_ref: (1, 1, C, tile_lp)     bf16 zero-padded input, spatial flattened row-major into
                                  lanes; the window already contains the 1-row halo.
    w_ref: (9*Cp, C)              bf16 tap weights grouped by lane shift (Cp-aligned groups).
    b_ref: (Cp, 1)                f32 bias (rows >= C are zero).
    o_ref: (1, 1, 4, Cp, lout)    parity planes 2*py+px, lane-dense (lout multiple of 128).
    """
    x = x_ref[0, 0, :, :]                                  # (C, tile_lp) bf16

    # The four distinct lane shifts of the padded flat buffer (3 real shifts + identity).
    s11 = wp2 + 1
    xs11 = x[:, s11:s11 + lout]                            # up[r,   c]
    xs10 = x[:, wp2:wp2 + lout]                            # up[r,   c-1]
    xs01 = x[:, 1:1 + lout]                                # up[r-1, c]
    xs00 = x[:, 0:lout]                                    # up[r-1, c-1]   (no shift)

    w = w_ref[...]
    f32 = jnp.float32
    # Four MXU contractions keyed by shift; results are already grouped per parity plane.
    t11 = jnp.dot(w[0:4 * cp, :], xs11, preferred_element_type=f32)        # (4Cp, lout)
    t01 = jnp.dot(w[6 * cp:8 * cp, :], xs01, preferred_element_type=f32)   # (2Cp, lout)
    t10 = jnp.dot(w[4 * cp:6 * cp, :], xs10, preferred_element_type=f32)   # (2Cp, lout)
    t00 = jnp.dot(w[8 * cp:9 * cp, :], xs00, preferred_element_type=f32)   # ( Cp, lout)

    bias = jnp.broadcast_to(b_ref[...], (cp, lout))        # hoisted once, reused 4x

    od = o_ref.dtype
    # Store each plane as soon as its inputs are ready (writeback overlaps remaining matmuls).
    o_ref[0, 0, 3, :, :] = (t11[3 * cp:4 * cp] + bias).astype(od)                       # odd , odd
    o_ref[0, 0, 1, :, :] = (t11[cp:2 * cp] + t01[cp:2 * cp] + bias).astype(od)          # even, odd
    o_ref[0, 0, 2, :, :] = (t11[2 * cp:3 * cp] + t10[cp:2 * cp] + bias).astype(od)      # odd , even
    o_ref[0, 0, 0, :, :] = (t11[0:cp] + t10[0:cp] + t01[0:cp] + t00 + bias).astype(od)  # even, even


def _pick_row_tile(wide_rows, wp2, cp, batch):
    # Keep the dominant per-step VMEM users (~26*Cp f32 "rows" per output lane) under ~18 MiB.
    lane_budget = max(wp2, (18 * 2 ** 20) // (26 * cp * 4))
    tr = max(1, min(wide_rows, lane_budget // wp2))
    if batch == 1 and wide_rows > 1:
        # v7x has 2 TensorCores: guarantee >=2 parallel grid steps even when N == 1.
        tr = min(tr, -(-wide_rows // 2))
    return int(tr)


def _stack_weights(weight, cp, dtype):
    """Tap weights grouped by lane shift, each group padded to Cp rows (sublane aligned)."""
    c = weight.shape[0]
    w_t = jnp.transpose(weight, (2, 3, 1, 0))              # (kh, kw, co, ci)
    taps = ((0, 0), (0, 1), (1, 0), (1, 1),                # shift +wp2+1 : planes ee, eo, oe, oo
            (0, 2), (1, 2),                                # shift +wp2   : planes ee, oe
            (2, 0), (2, 1),                                # shift +1     : planes ee, eo
            (2, 2))                                        # shift +0     : plane  ee
    blocks = [jnp.pad(w_t[kh, kw], ((0, cp - c), (0, 0))) for kh, kw in taps]
    return jnp.concatenate(blocks, axis=0).astype(dtype)   # (9*Cp, C)


def _upconv_pallas(x_nchw, weight, bias, row_tile=None):
    """ConvTranspose2d(C, C, k=3, stride=2, padding=0, bias=True), NCHW in / NCHW out."""
    N, C, H, W = x_nchw.shape
    wp2 = W + 2
    wide_rows = H + 1
    cp = _round_up(C, 8)                           # sublane-aligned tap/output-channel stride

    tr = row_tile if row_tile is not None else _pick_row_tile(wide_rows, wp2, cp, N)
    tr = max(1, min(int(tr), wide_rows))
    n_rt = -(-wide_rows // tr)

    lout = _round_up(tr * wp2, 128)                # lane-dense output tile (multiple of 128)
    tile_lp = _round_up(lout + wp2 + 1, 128)       # input window covering all 4 lane shifts

    # Zero-pad (1 top, 1 left/right, enough bottom for the last tile window), flatten spatial
    # row-major into lanes, and slice overlapping per-row-tile halo windows.
    hp = -(-((n_rt - 1) * tr * wp2 + tile_lp) // wp2)
    xpad = jnp.pad(x_nchw.astype(jnp.bfloat16),
                   ((0, 0), (0, 0), (1, hp - 1 - H), (1, 1)))
    xpf = xpad.reshape(N, C, hp * wp2)
    # TODO(synk): fold the pad + halo-window gather into the kernel with manual (pl.ANY) DMAs
    #             to remove this extra HBM copy of the input.
    xt = jnp.stack([xpf[:, :, r * tr * wp2: r * tr * wp2 + tile_lp] for r in range(n_rt)],
                   axis=1)                         # (N, n_rt, C, tile_lp) bf16

    wall = _stack_weights(weight, cp, jnp.bfloat16)                        # (9*Cp, C) bf16
    b2 = jnp.pad(bias.reshape(C, 1), ((0, cp - C), (0, 0))).astype(jnp.float32)

    # Explicit VMEM budget: double-buffered blocks + in-kernel temporaries, 2x headroom.
    per_step = (2 * C * tile_lp * 2          # input tile (bf16, double-buffered)
                + 2 * 9 * cp * C * 2         # resident weights
                + 2 * cp * 128 * 4           # bias
                + 2 * 4 * cp * lout * 4      # output tile (f32, double-buffered)
                + 9 * cp * lout * 4          # per-shift matmul results
                + 4 * C * lout * 2           # shifted x copies
                + 2 * cp * lout * 4)         # bias broadcast + one live plane
    vmem_limit = int(min(56 * 2 ** 20, max(24 * 2 ** 20, 2 * per_step)))

    kern = functools.partial(_upconv_parity_kernel, cp=cp, wp2=wp2, lout=lout)
    planes = pl.pallas_call(
        kern,
        out_shape=jax.ShapeDtypeStruct((N, n_rt, 4, cp, lout), x_nchw.dtype),
        grid=(N, n_rt),
        in_specs=[
            pl.BlockSpec((1, 1, C, tile_lp), lambda n, r: (n, r, 0, 0)),
            pl.BlockSpec((9 * cp, C), lambda n, r: (0, 0)),    # constant index -> resident
            pl.BlockSpec((cp, 1), lambda n, r: (0, 0)),
        ],
        out_specs=pl.BlockSpec((1, 1, 4, cp, lout), lambda n, r: (n, r, 0, 0, 0)),
        compiler_params=pltpu.CompilerParams(
            dimension_semantics=("parallel", "parallel"),
            vmem_limit_bytes=vmem_limit),
    )(xt, wall, b2)

    # Interleave parity planes / row tiles back to NCHW and crop to the valid (2H+1, 2W+1).
    # TODO(synk): a strided-lane store (pl.ds stride=2) inside the kernel would remove this pass.
    p = planes[..., :tr * wp2].reshape(N, n_rt, 2, 2, cp, tr, wp2)[:, :, :, :, :C]
    p = jnp.transpose(p, (0, 4, 1, 5, 2, 6, 3))            # (N, co, rt, tr, py, c, px)
    y = p.reshape(N, C, n_rt * tr * 2, wp2 * 2)
    return y[:, :, :2 * H + 1, :2 * W + 1]


def _center_crop(x, target_h, target_w):
    # Mirrors CenterCropConcat.center_crop exactly (variable names kept as in PyTorch).
    current_height, current_width = x.shape[2], x.shape[3]
    min_h = (current_width - target_w) // 2
    min_w = (current_height - target_h) // 2
    return x[:, :, min_w:min_w + target_h, min_h:min_h + target_w]


@functools.partial(jax.jit, static_argnames=("row_tile",))
def transition_up(upsample, skip, weight, bias, row_tile=None):
    """Forward pass of TransitionUp.  All tensors NCHW (PyTorch convention)."""
    res = _upconv_pallas(upsample, weight, bias, row_tile=row_tile)
    th = min(res.shape[2], skip.shape[2])
    tw = min(res.shape[3], skip.shape[3])
    res_c = _center_crop(res, th, tw)
    skip_c = _center_crop(skip, th, tw)
    return jnp.concatenate([res_c, skip_c], axis=1)        # concat on channel dim


# ---------------------------------------------------------------------------
# Pure-numpy reference (direct PyTorch semantics) for correctness checking.
# ---------------------------------------------------------------------------
def _ref_transition_up(up, skip, weight, bias):
    N, C, H, W = up.shape
    Ho, Wo = 2 * H + 1, 2 * W + 1
    out = np.zeros((N, C, Ho, Wo), np.float32)
    for n in range(N):
        for ci in range(C):
            for co in range(C):
                for ih in range(H):
                    for iw in range(W):
                        for kh in range(3):
                            for kw in range(3):
                                out[n, co, 2 * ih + kh, 2 * iw + kw] += (
                                    up[n, ci, ih, iw] * weight[ci, co, kh, kw])
    out += bias.reshape(1, C, 1, 1)

    def crop(x, th, tw):
        ch, cw = x.shape[2], x.shape[3]
        mh = (cw - tw) // 2
        mw = (ch - th) // 2
        return x[:, :, mw:mw + th, mh:mh + tw]

    th = min(out.shape[2], skip.shape[2])
    tw = min(out.shape[3], skip.shape[3])
    return np.concatenate([crop(out, th, tw), crop(skip, th, tw)], axis=1)


if __name__ == "__main__":
    key = jax.random.PRNGKey(0)
    k1, k2, k3, k4 = jax.random.split(key, 4)

    N, C_up, H, W = 2, 4, 8, 8         # upsample path:  (2, 4, 8, 8)  -> upconv (2, 4, 17, 17)
    C_skip, Hs, Ws = 3, 16, 16         # skip path:      (2, 3, 16, 16)

    upsample = jax.random.normal(k1, (N, C_up, H, W), dtype=jnp.float32)
    skip = jax.random.normal(k2, (N, C_skip, Hs, Ws), dtype=jnp.float32)

    # ConvTranspose2d(C_up, C_up, 3) parameters: weight (Cin, Cout, 3, 3), bias (Cout,)
    weight = 0.1 * jax.random.normal(k3, (C_up, C_up, 3, 3), dtype=jnp.float32)
    bias = 0.1 * jax.random.normal(k4, (C_up,), dtype=jnp.float32)

    ref = _ref_transition_up(np.asarray(upsample), np.asarray(skip),
                             np.asarray(weight), np.asarray(bias))
    expected_shape = (N, C_up + C_skip, min(2 * H + 1, Hs), min(2 * W + 1, Ws))

    # Exercise both the single-tile (heuristic) path and the multi-row-tile path.
    for rt in (None, 4):
        out = transition_up(upsample, skip, weight, bias, row_tile=rt)
        out = jax.block_until_ready(out)
        assert out.shape == expected_shape, (out.shape, expected_shape)
        np.testing.assert_allclose(np.asarray(out), ref, rtol=2e-2, atol=2e-2)

    print("KERNEL_OK")
</pallas_src>

<mosaic_0001>
module attributes {stable_mosaic.version = 11 : i64} {
  func.func @_upconv_parity_kernel(%arg0: i32, %arg1: i32, %arg2: memref<1x1x4x256xbf16, #tpu.memory_space<vmem>>, %arg3: memref<72x4xbf16, #tpu.memory_space<vmem>>, %arg4: memref<8x1xf32, #tpu.memory_space<vmem>>, %arg5: memref<1x1x4x8x128xf32, #tpu.memory_space<vmem>>) attributes {dimension_semantics = [#tpu.dimension_semantics<parallel>, #tpu.dimension_semantics<parallel>], iteration_bounds = array<i64: 2, 1>, scalar_prefetch = 0 : i64, scratch_operands = 0 : i64, tpu.core_type = #tpu.core_type<tc>, window_params = [{transform_indices = @transform_0, window_bounds = array<i64: 1, 1, 4, 256>}, {pipeline_mode = #tpu.pipeline_mode<synchronous>, transform_indices = @transform_1, window_bounds = array<i64: 72, 4>}, {pipeline_mode = #tpu.pipeline_mode<synchronous>, transform_indices = @transform_2, window_bounds = array<i64: 8, 1>}, {transform_indices = @transform_3, window_bounds = array<i64: 1, 1, 4, 8, 128>}]} {
    %c0 = arith.constant 0 : index
    %c0_0 = arith.constant 0 : index
    %c0_1 = arith.constant 0 : index
    %c0_2 = arith.constant 0 : index
    %0 = vector.load %arg2[%c0, %c0_0, %c0_1, %c0_2] : memref<1x1x4x256xbf16, #tpu.memory_space<vmem>>, vector<1x1x4x256xbf16>
    %1 = vector.shape_cast %0 : vector<1x1x4x256xbf16> to vector<4x256xbf16>
    %2 = vector.extract_strided_slice %1 {offsets = [0, 11], sizes = [4, 128], strides = [1, 1]} : vector<4x256xbf16> to vector<4x128xbf16>
    %3 = vector.extract_strided_slice %1 {offsets = [0, 10], sizes = [4, 128], strides = [1, 1]} : vector<4x256xbf16> to vector<4x128xbf16>
    %4 = vector.extract_strided_slice %1 {offsets = [0, 1], sizes = [4, 128], strides = [1, 1]} : vector<4x256xbf16> to vector<4x128xbf16>
    %5 = vector.extract_strided_slice %1 {offsets = [0, 0], sizes = [4, 128], strides = [1, 1]} : vector<4x256xbf16> to vector<4x128xbf16>
    %c0_3 = arith.constant 0 : index
    %c0_4 = arith.constant 0 : index
    %6 = vector.load %arg3[%c0_3, %c0_4] : memref<72x4xbf16, #tpu.memory_space<vmem>>, vector<72x4xbf16>
    %7 = vector.extract_strided_slice %6 {offsets = [0, 0], sizes = [32, 4], strides = [1, 1]} : vector<72x4xbf16> to vector<32x4xbf16>
    %cst = arith.constant dense<0.000000e+00> : vector<32x128xf32>
    %8 = tpu.matmul %7, %2, %cst {dimension_numbers = #tpu.dot_dimension_numbers<[1], [0], [0], [1], [0, 0, 1, 1], [], []>} : vector<32x4xbf16>, vector<4x128xbf16>, vector<32x128xf32> -> vector<32x128xf32>
    %9 = vector.extract_strided_slice %6 {offsets = [48, 0], sizes = [16, 4], strides = [1, 1]} : vector<72x4xbf16> to vector<16x4xbf16>
    %cst_5 = arith.constant dense<0.000000e+00> : vector<16x128xf32>
    %10 = tpu.matmul %9, %4, %cst_5 {dimension_numbers = #tpu.dot_dimension_numbers<[1], [0], [0], [1], [0, 0, 1, 1], [], []>} : vector<16x4xbf16>, vector<4x128xbf16>, vector<16x128xf32> -> vector<16x128xf32>
    %11 = vector.extract_strided_slice %6 {offsets = [32, 0], sizes = [16, 4], strides = [1, 1]} : vector<72x4xbf16> to vector<16x4xbf16>
    %cst_6 = arith.constant dense<0.000000e+00> : vector<16x128xf32>
    %12 = tpu.matmul %11, %3, %cst_6 {dimension_numbers = #tpu.dot_dimension_numbers<[1], [0], [0], [1], [0, 0, 1, 1], [], []>} : vector<16x4xbf16>, vector<4x128xbf16>, vector<16x128xf32> -> vector<16x128xf32>
    %13 = vector.extract_strided_slice %6 {offsets = [64, 0], sizes = [8, 4], strides = [1, 1]} : vector<72x4xbf16> to vector<8x4xbf16>
    %cst_7 = arith.constant dense<0.000000e+00> : vector<8x128xf32>
    %14 = tpu.matmul %13, %5, %cst_7 {dimension_numbers = #tpu.dot_dimension_numbers<[1], [0], [0], [1], [0, 0, 1, 1], [], []>} : vector<8x4xbf16>, vector<4x128xbf16>, vector<8x128xf32> -> vector<8x128xf32>
    %c0_8 = arith.constant 0 : index
    %c0_9 = arith.constant 0 : index
    %15 = vector.load %arg4[%c0_8, %c0_9] : memref<8x1xf32, #tpu.memory_space<vmem>>, vector<8x1xf32>
    %16 = vector.shape_cast %15 : vector<8x1xf32> to vector<8x1xf32>
    %17 = vector.broadcast %16 : vector<8x1xf32> to vector<8x128xf32>
    %18 = vector.extract_strided_slice %8 {offsets = [24, 0], sizes = [8, 128], strides = [1, 1]} : vector<32x128xf32> to vector<8x128xf32>
    %19 = arith.addf %18, %17 : vector<8x128xf32>
    %c0_10 = arith.constant 0 : index
    %c0_11 = arith.constant 0 : index
    %c3 = arith.constant 3 : index
    %c0_12 = arith.constant 0 : index
    %c0_13 = arith.constant 0 : index
    %20 = vector.load %arg5[%c0_10, %c0_11, %c3, %c0_12, %c0_13] : memref<1x1x4x8x128xf32, #tpu.memory_space<vmem>>, vector<1x1x1x8x128xf32>
    %21 = vector.shape_cast %20 : vector<1x1x1x8x128xf32> to vector<8x128xf32>
    %22 = vector.shape_cast %19 : vector<8x128xf32> to vector<1x1x1x8x128xf32>
    tpu.vector_store %arg5[%c0_10, %c0_11, %c3, %c0_12, %c0_13], %22 {strides = array<i32>} : memref<1x1x4x8x128xf32, #tpu.memory_space<vmem>>, vector<1x1x1x8x128xf32>,
    %23 = vector.extract_strided_slice %8 {offsets = [8, 0], sizes = [8, 128], strides = [1, 1]} : vector<32x128xf32> to vector<8x128xf32>
    %24 = vector.extract_strided_slice %10 {offsets = [8, 0], sizes = [8, 128], strides = [1, 1]} : vector<16x128xf32> to vector<8x128xf32>
    %25 = arith.addf %23, %24 : vector<8x128xf32>
    %26 = arith.addf %25, %17 : vector<8x128xf32>
    %c0_14 = arith.constant 0 : index
    %c0_15 = arith.constant 0 : index
    %c1 = arith.constant 1 : index
    %c0_16 = arith.constant 0 : index
    %c0_17 = arith.constant 0 : index
    %27 = vector.load %arg5[%c0_14, %c0_15, %c1, %c0_16, %c0_17] : memref<1x1x4x8x128xf32, #tpu.memory_space<vmem>>, vector<1x1x1x8x128xf32>
    %28 = vector.shape_cast %27 : vector<1x1x1x8x128xf32> to vector<8x128xf32>
    %29 = vector.shape_cast %26 : vector<8x128xf32> to vector<1x1x1x8x128xf32>
    tpu.vector_store %arg5[%c0_14, %c0_15, %c1, %c0_16, %c0_17], %29 {strides = array<i32>} : memref<1x1x4x8x128xf32, #tpu.memory_space<vmem>>, vector<1x1x1x8x128xf32>,
    %30 = vector.extract_strided_slice %8 {offsets = [16, 0], sizes = [8, 128], strides = [1, 1]} : vector<32x128xf32> to vector<8x128xf32>
    %31 = vector.extract_strided_slice %12 {offsets = [8, 0], sizes = [8, 128], strides = [1, 1]} : vector<16x128xf32> to vector<8x128xf32>
    %32 = arith.addf %30, %31 : vector<8x128xf32>
    %33 = arith.addf %32, %17 : vector<8x128xf32>
    %c0_18 = arith.constant 0 : index
    %c0_19 = arith.constant 0 : index
    %c2 = arith.constant 2 : index
    %c0_20 = arith.constant 0 : index
    %c0_21 = arith.constant 0 : index
    %34 = vector.load %arg5[%c0_18, %c0_19, %c2, %c0_20, %c0_21] : memref<1x1x4x8x128xf32, #tpu.memory_space<vmem>>, vector<1x1x1x8x128xf32>
    %35 = vector.shape_cast %34 : vector<1x1x1x8x128xf32> to vector<8x128xf32>
    %36 = vector.shape_cast %33 : vector<8x128xf32> to vector<1x1x1x8x128xf32>
    tpu.vector_store %arg5[%c0_18, %c0_19, %c2, %c0_20, %c0_21], %36 {strides = array<i32>} : memref<1x1x4x8x128xf32, #tpu.memory_space<vmem>>, vector<1x1x1x8x128xf32>,
    %37 = vector.extract_strided_slice %8 {offsets = [0, 0], sizes = [8, 128], strides = [1, 1]} : vector<32x128xf32> to vector<8x128xf32>
    %38 = vector.extract_strided_slice %12 {offsets = [0, 0], sizes = [8, 128], strides = [1, 1]} : vector<16x128xf32> to vector<8x128xf32>
    %39 = arith.addf %37, %38 : vector<8x128xf32>
    %40 = vector.extract_strided_slice %10 {offsets = [0, 0], sizes = [8, 128], strides = [1, 1]} : vector<16x128xf32> to vector<8x128xf32>
    %41 = arith.addf %39, %40 : vector<8x128xf32>
    %42 = arith.addf %41, %14 : vector<8x128xf32>
    %43 = arith.addf %42, %17 : vector<8x128xf32>
    %c0_22 = arith.constant 0 : index
    %c0_23 = arith.constant 0 : index
    %c0_24 = arith.constant 0 : index
    %c0_25 = arith.constant 0 : index
    %c0_26 = arith.constant 0 : index
    %44 = vector.load %arg5[%c0_22, %c0_23, %c0_24, %c0_25, %c0_26] : memref<1x1x4x8x128xf32, #tpu.memory_space<vmem>>, vector<1x1x1x8x128xf32>
    %45 = vector.shape_cast %44 : vector<1x1x1x8x128xf32> to vector<8x128xf32>
    %46 = vector.shape_cast %43 : vector<8x128xf32> to vector<1x1x1x8x128xf32>
    tpu.vector_store %arg5[%c0_22, %c0_23, %c0_24, %c0_25, %c0_26], %46 {strides = array<i32>} : memref<1x1x4x8x128xf32, #tpu.memory_space<vmem>>, vector<1x1x1x8x128xf32>,
    return
  }
  func.func @transform_0(%arg0: i32, %arg1: i32) -> (i32, i32, i32, i32) {
    %c0_i32 = arith.constant 0 : i32
    %c0_i32_0 = arith.constant 0 : i32
    %c0_i32_1 = arith.constant 0 : i32
    return %arg0, %arg1, %c0_i32, %c0_i32_0 : i32, i32, i32, i32
  }
  func.func @transform_1(%arg0: i32, %arg1: i32) -> (i32, i32) {
    %c0_i32 = arith.constant 0 : i32
    %c0_i32_0 = arith.constant 0 : i32
    %c0_i32_1 = arith.constant 0 : i32
    return %c0_i32, %c0_i32_0 : i32, i32
  }
  func.func @transform_2(%arg0: i32, %arg1: i32) -> (i32, i32) {
    %c0_i32 = arith.constant 0 : i32
    %c0_i32_0 = arith.constant 0 : i32
    %c0_i32_1 = arith.constant 0 : i32
    return %c0_i32, %c0_i32_0 : i32, i32
  }
  func.func @transform_3(%arg0: i32, %arg1: i32) -> (i32, i32, i32, i32, i32) {
    %c0_i32 = arith.constant 0 : i32
    %c0_i32_0 = arith.constant 0 : i32
    %c0_i32_1 = arith.constant 0 : i32
    %c0_i32_2 = arith.constant 0 : i32
    return %arg0, %arg1, %c0_i32, %c0_i32_0, %c0_i32_1 : i32, i32, i32, i32, i32
  }
}

</mosaic_0001>

<bundles_post_ra>
// kernel: transition_up.1
= control target key start
LH: loop header
LB: loop body
LE: loop exit
PB: predicated region body
PF: predicated region fallthrough
CT: control target
= control target key end

     0   :  { %s592_s12 = smov 0   ;;  %s594_s13 = smov 0   ;;  %s656_s0 = inlined_call_operand.vmem [shape: bf16[2,1,4,256], index: 0, kind: input, shape index: {}]   ;;  %s657_s1 = inlined_call_operand.vmem [shape: bf16[72,4], index: 1, kind: input, shape index: {}]   ;;  %s658_s2 = inlined_call_operand.vmem [shape: f32[8,1], index: 2, kind: input, shape index: {}]   ;;  %s659_s3 = inlined_call_operand.vmem [shape: f32[2,1,4,8,128], index: 3, kind: output, shape index: {}]  }
   0x1   :  { %s596_s14 = smov 0  }
   0x2 LB: > { %s25_s15 = sadd.s32 1, %s562_s13  ;;  %p478_p0 = scmp.ge.s32.totalorder %s566_s14, 1  ;;  %s566_s14 = sphi %s596_s14, %s13_s14   ;;  %s562_s13 = sphi %s594_s13, %s661_s13   ;;  %s558_s12 = sphi %s592_s12, %s660_s12  }
   0x3   : > { %p27_p1 = scmp.ge.s32.totalorder %s25_s15, 2  ;;  %p157_p2 = scmp.lt.s32.totalorder %s566_s14, 3 }
   0x5   : > { %s663_s15 = smov (%p27_p1, %s25_s15), 0  ;;  %p158_p3 = pnand %p478_p0, %p157_p2 }
   0x6   : > { %p189_p4 = scmp.lt.s32.totalorder (!%p158_p3), %s558_s12, 1  ;;  %s568_s20 = smov (!%p158_p3), 117  }
   0x7   : > { %161 = sbr.rel (%p158_p3) target bundleno = 313 (0x139), region = 32  ;;  %s569_s21 = smov (!%p158_p3), 127  }
   0x8   : > { %s570_s22 = smov (!%p158_p3), 118  }
   0xc   : > { %s665_s12 = smov (!%p189_p4, %s558_s12), 1  ;;  %vm247_vm0 = vcmask 1041408   ;;  %vm284_vm1 = vcmask 1039360   ;;  %vm240_vm2 = vcmask 31744   ;;  %v514_v12 = vld [vmem:[%s657_s1 + $0x18] sm:$0xff]  ;;  %v360_v14 = vld [vmem:[%s658_s2] sm:$0xff] }
   0xd   : > { %s509_s16 = sshll.u32 %s665_s12, 2  ;;  %v217_v13 = vld [vmem:[%s657_s1 + $0x20] sm:$0xf]  ;;  %v571_v15 = vmov 0   ;;  %vm238_vm3 = vcmask 957440   ;;  %vm320_vm4 = vcmask 965632  }
   0xe   : > { %s197_s19 = scalar_lea.vmem %s656_s0, %s509_s16  ;;  %543 = vset.pattern.permute.xlu0 %v571_v15  ;;  %v511_v20 = vld [vmem:[%s657_s1] sm:$0xff]  ;;  %v512_v25 = vld [vmem:[%s657_s1 + $0x8] sm:$0xff]  ;;  %v513_v26 = vld [vmem:[%s657_s1 + $0x10] sm:$0xff]  ;;  %s510_s8 = sshll.u32 %s665_s12, 5 }
   0xf   : > { %v208_v0 = vld [vmem:[%s197_s19] sm:$0xf]  ;;  %s206_s11 = scalar_lea.vmem %s659_s3, %s510_s8 }
  0x10   : > { %229 = vst [vmem:[#allocation1] ss:$4 sm:$0xff] %v208_v0  ;;  %v345_v8 = vsel %vm247_vm0, %v208_v0, 0 }
  0x11   : > { %354 = vmatpush.bf16.msra.mxu3 %v345_v8 }
  0x14   : > { %503 = vmatmul.msk.bf16.vlgmr.msra.gmra.mxu3 %vm240_vm2, %v217_v13 }
  0x17   : > { %v230_v1 = vld.sshfl [vmem:[#allocation1] sm:$0xff pattern:$0x73625140]  ;;  %v232_v2 = vld.sshfl [vmem:[#allocation1 + $0x8] sm:$0xff pattern:$0x73625140] }
  0x18   : > { %234 = vrot.lane.b32.xlu0 %v230_v1, %s568_s20  ;;  %275 = vst [vmem:[#allocation1] ss:$4 sm:$0xff] %v208_v0 }
  0x1f   : > { %v276_v3 = vld.sshfl [vmem:[#allocation1] sm:$0xff pattern:$0x73625140]  ;;  %v278_v4 = vld.sshfl [vmem:[#allocation1 + $0x8] sm:$0xff pattern:$0x73625140] }
  0x20   : > { %236 = vrot.lane.b32.xlu0 %v232_v2, %s568_s20  ;;  %311 = vst [vmem:[#allocation1] ss:$4 sm:$0xff] %v208_v0  ;;  %280 = vrot.lane.b32.xlu2 %v276_v3, %s569_s21 }
  0x27   : > { %v312_v5 = vld.sshfl [vmem:[#allocation1] sm:$0xff pattern:$0x73625140]  ;;  %v314_v6 = vld.sshfl [vmem:[#allocation1 + $0x8] sm:$0xff pattern:$0x73625140] }
  0x28   : > { %316 = vrot.lane.b32.xlu1 %v312_v5, %s570_s22  ;;  %282 = vrot.lane.b32.xlu2 %v278_v4, %s569_s21 }
  0x29   : > { %363 = vperm.xlu0 %543, %v360_v14  }
  0x30   : > { %318 = vrot.lane.b32.xlu1 %v314_v6, %s570_s22 }
  0x7a   : > { %v281_v7 = vpop.permute.xlu2 %280 }
  0x82   : > { %v283_v9 = vpop.permute.xlu2 %282 }
  0x83   : > { %v285_v10 = vsel %vm284_vm1, %v281_v7, %v283_v9 }
  0x84   : > { %v290_v11 = vsel %vm247_vm0, %v285_v10, 0 }
  0x85   : > { %299 = vmatpush.bf16.msra.mxu1 %v290_v11 }
  0x88   : > { %497 = vmatmul.msk.bf16.vlgmr.msra.gmra.mxu1 %vm240_vm2, %v514_v12 }
  0x8a   : > { %v235_v16 = vpop.permute.xlu0 %234 }
  0x92   : > { %v237_v17 = vpop.permute.xlu0 %236 }
  0x93   : > { %v239_v18 = vsel %vm238_vm3, %v235_v16, %v237_v17 }
  0x94   : > { %v249_v19 = vsel %vm247_vm0, %v239_v18, 0 }
  0x95   : > { %258 = vmatpush.bf16.msra.mxu0 %v249_v19 }
  0x97   : > { %v356_v27 = vpop.f32.mrf.mxu3 }
  0x98   : > { %491 = vmatmul.msk.bf16.vlgmr.msra.gmra.mxu0 %vm240_vm2, %v511_v20 }
  0x9a   : > { %v317_v21 = vpop.permute.xlu1 %316 }
  0x9b   : > { %v364_v33 = vpop.permute.xlu0 %363 }
  0x9f   : > { %v358_v28 = vpop.f32.mrf.mxu3 }
  0xa2   : > { %v319_v22 = vpop.permute.xlu1 %318 }
  0xa3   : > { %v321_v23 = vsel %vm320_vm4, %v317_v21, %v319_v22 }
  0xa4   : > { %v326_v24 = vsel %vm247_vm0, %v321_v23, 0 }
  0xa5   : > { %335 = vmatpush.bf16.msra.mxu2 %v326_v24 }
  0xa8   : > { %492 = vmatmul.msk.bf16.gmra.mxu0 %vm240_vm2, %v512_v25  ;;  %502 = vmatmul.msk.bf16.vlgmr.msra.gmra.mxu2 %vm240_vm2, %v513_v26 }
 0x105   : > { %v301_v29 = vpop.f32.mrf.mxu1 }
 0x10d   : > { %v303_v31 = vpop.f32.mrf.mxu1 }
 0x115   : > { %v260_v30 = vpop.f32.mrf.mxu0 }
 0x11d   : > { %v262_v32 = vpop.f32.mrf.mxu0 }
 0x11e   : > { %v369_v34 = vadd.f32 %v303_v31, %v262_v32 }
 0x120   : > { %v370_v35 = vadd.f32 %v369_v34, %v364_v33 }
 0x122   : > { %505 = vst [vmem:[%s206_s11 + $0x8] sm:$0xff] %v370_v35 }
 0x125   : > { %v265_v36 = vpop.f32.mrf.mxu0 }
 0x12b   : > { %v337_v37 = vpop.f32.mrf.mxu2 }
 0x12c   : > { %v377_v38 = vadd.f32 %v337_v37, %v260_v30 }
 0x12d   : > { %v267_v39 = vpop.f32.mrf.mxu0 }
 0x12e   : > { %v378_v40 = vadd.f32 %v377_v38, %v301_v29  ;;  %v366_v41 = vadd.f32 %v364_v33, %v267_v39 }
 0x130   : > { %v379_v42 = vadd.f32 %v378_v40, %v356_v27  ;;  %504 = vst [vmem:[%s206_s11 + $0x18] sm:$0xff] %v366_v41 }
 0x132   : > { %v380_v43 = vadd.f32 %v379_v42, %v364_v33 }
 0x133   : > { %v339_v44 = vpop.f32.mrf.mxu2 }
 0x134   : > { %381 = vst [vmem:[%s206_s11] sm:$0xff] %v380_v43  ;;  %v373_v45 = vadd.f32 %v339_v44, %v265_v36 }
 0x136   : > { %v374_v46 = vadd.f32 %v373_v45, %v364_v33 }
 0x138   : > { %506 = vst [vmem:[%s206_s11 + $0x10] sm:$0xff] %v374_v46 }
 0x139 PF: > { %s13_s14 = sadd.s32 1, %s566_s14   ;;  %s660_s12 = smov %s562_s13 }
 0x13a   : > { %p10_p5 = scmp.ge.s32.totalorder %s13_s14, 4   ;;  %s661_s13 = smov %s663_s15 }
 0x13c   :  { %12 = sbr.rel (!%p10_p5) target bundleno = 2 (0x2), region = 65 }

</bundles_post_ra>
